<compile_context>
chip_gen: v6e
topology: v6e:2x2x1
jax: 0.10.0
libtpu: 0.0.40
codegen_flags: <defaults>
</compile_context>

<pallas_src>
import functools
import math

import jax
import jax.numpy as jnp
from jax.experimental import pallas as pl
from jax.experimental.pallas import tpu as pltpu


# ---------------------------------------------------------------------------
# Kernel body
# ---------------------------------------------------------------------------
def _gru_gate_kernel(w_ref, u_ref, b_ref, x_ref, h_ref, o_ref, *, activation):
    # Two MXU matmuls over the (small, resident) K = rows axis, f32 accumulation.
    pre = jnp.dot(w_ref[...], x_ref[...], preferred_element_type=jnp.float32)
    pre = pre + jnp.dot(u_ref[...], h_ref[...], preferred_element_type=jnp.float32)
    pre = pre + b_ref[...].astype(jnp.float32)
    if activation == "sigmoid":
        act = jax.nn.sigmoid(pre)          # exp + recip -> EUP (free slot)
    elif activation == "tanh":
        act = jnp.tanh(pre)
    else:
        raise ValueError(f"unsupported activation: {activation}")
    o_ref[...] = act.astype(o_ref.dtype)   # cast once on store


# ---------------------------------------------------------------------------
# Tiling helpers
# ---------------------------------------------------------------------------
def _round_up(x, m):
    return (x + m - 1) // m * m


def _multi_tensorcore():
    """Heuristic: v7x has 2 TensorCores/chip; v5e/v6e have 1."""
    try:
        kind = jax.devices()[0].device_kind.lower()
    except Exception:
        return False
    return ("v7" in kind) or ("7x" in kind)


def _pick_col_tile(out_rows, k, cols, in_itemsize, out_itemsize,
                   vmem_budget_bytes=16 * 1024 * 1024, max_tile=8192):
    """Largest column tile that keeps the double-buffered streamed working set
    under `vmem_budget_bytes` (sized for v7x's smaller VMEM; trivially fits
    v5e/v6e), capped at `max_tile`, multiple of 128 unless it covers all cols.
    On multi-TC chips, keep >= 2 column blocks so the 'parallel' axis shards.
    """
    # Streamed bytes per output column: x + hidden (K rows) + bias + out.
    per_col = 2 * k * in_itemsize + out_rows * in_itemsize + out_rows * out_itemsize
    budget_cols = max(128, vmem_budget_bytes // (2 * per_col))   # 2 = double buffer
    tc = max(128, min(max_tile, (budget_cols // 128) * 128))

    if _multi_tensorcore() and cols >= 256:
        half = _round_up(-(-cols // 2), 128)   # ceil(cols/2) rounded up to 128
        tc = min(tc, half)

    if tc >= cols:
        return cols            # single full-width block (no masking at all)
    return tc                  # multiple of 128; last block may be ragged


# ---------------------------------------------------------------------------
# pallas_call wrapper
# ---------------------------------------------------------------------------
def _gru_gate_call(W, U, bias, x, hidden, *, activation, compute_dtype):
    out_rows, k = W.shape
    rows_x, cols = x.shape
    assert U.shape == (out_rows, k)
    assert rows_x == k and hidden.shape == (k, cols)
    assert bias.shape == (out_rows, cols)

    out_dtype = x.dtype
    cd = jnp.dtype(compute_dtype) if compute_dtype is not None else jnp.dtype(x.dtype)

    # For best performance keep x/hidden/bias in `compute_dtype` upstream so
    # these casts are no-ops (the streamed operands dominate HBM traffic).
    Wc = W.astype(cd)
    Uc = U.astype(cd)
    bc = bias.astype(cd)
    xc = x.astype(cd)
    hc = hidden.astype(cd)

    out_itemsize = jnp.dtype(out_dtype).itemsize
    tc = _pick_col_tile(out_rows, k, cols, cd.itemsize, out_itemsize)
    grid = (pl.cdiv(cols, tc),)

    kernel = functools.partial(_gru_gate_kernel, activation=activation)

    cost = pl.CostEstimate(
        flops=2 * 2 * out_rows * k * cols + 2 * out_rows * cols,
        transcendentals=(2 if activation == "sigmoid" else 1) * out_rows * cols,
        bytes_accessed=(Wc.size + Uc.size + bc.size + xc.size + hc.size) * cd.itemsize
        + out_rows * cols * out_itemsize,
    )

    return pl.pallas_call(
        kernel,
        out_shape=jax.ShapeDtypeStruct((out_rows, cols), out_dtype),
        grid_spec=pl.GridSpec(
            grid=grid,
            in_specs=[
                # Weights: same block every step -> VMEM-resident, one HBM read.
                pl.BlockSpec((out_rows, k), lambda j: (0, 0)),     # W
                pl.BlockSpec((out_rows, k), lambda j: (0, 0)),     # U
                # Streamed column tiles (default double-buffering).
                pl.BlockSpec((out_rows, tc), lambda j: (0, j)),    # bias
                pl.BlockSpec((k, tc), lambda j: (0, j)),           # x
                pl.BlockSpec((k, tc), lambda j: (0, j)),           # hidden
            ],
            out_specs=pl.BlockSpec((out_rows, tc), lambda j: (0, j)),
        ),
        compiler_params=pltpu.CompilerParams(
            # Independent column axis: shards across both TCs on v7x; harmless
            # (serial loop) on single-TC v5e/v6e.
            dimension_semantics=("parallel",),
            vmem_limit_bytes=32 * 1024 * 1024,
        ),
        cost_estimate=cost,
    )(Wc, Uc, bc, xc, hc)


def mat_gru_gate(W, U, bias, x, hidden, *, activation="sigmoid",
                 compute_dtype=jnp.bfloat16):
    """Pallas implementation of mat_GRU_gate.forward(x, hidden).

    compute_dtype: dtype used for the MXU matmuls and streamed HBM traffic
    (default bfloat16 per perf review; pass jnp.float32 or None for exact f32).
    Accumulation and the bias+activation epilogue are always f32; the output
    dtype matches x.dtype.
    """
    rows, cols = bias.shape
    assert W.shape == (rows, rows) and U.shape == (rows, rows)
    assert x.shape == (rows, cols) and hidden.shape == (rows, cols)
    return _gru_gate_call(W, U, bias, x, hidden,
                          activation=activation, compute_dtype=compute_dtype)


def mat_gru_gates_fused(Ws, Us, biases, x, hidden, *, activation="sigmoid",
                        compute_dtype=jnp.bfloat16):
    """Fuse several gates that share (x, hidden) and the same activation
    (e.g. GRU update + reset) into one pallas_call by stacking weights/biases
    along the output-row axis.  Returns one output per gate.

    NOTE: in a real model, hoist the weight stacking to weight-update time so
    it is not re-executed every forward.
    """
    assert len(Ws) == len(Us) == len(biases) >= 1
    rows = Ws[0].shape[0]
    W = jnp.concatenate(Ws, axis=0)       # (G*rows, rows)
    U = jnp.concatenate(Us, axis=0)       # (G*rows, rows)
    b = jnp.concatenate(biases, axis=0)   # (G*rows, cols)
    out = _gru_gate_call(W, U, b, x, hidden,
                         activation=activation, compute_dtype=compute_dtype)
    return [out[g * rows:(g + 1) * rows] for g in range(len(Ws))]


# ---------------------------------------------------------------------------
# Parameter init + reference
# ---------------------------------------------------------------------------
def init_params(key, rows, cols, dtype=jnp.float32):
    """Deterministic init mirroring mat_GRU_gate.__init__ / reset_param."""
    kw, ku = jax.random.split(key)
    stdv = 1.0 / math.sqrt(rows)  # t.size(1) == rows for W, U
    W = jax.random.uniform(kw, (rows, rows), dtype, minval=-stdv, maxval=stdv)
    U = jax.random.uniform(ku, (rows, rows), dtype, minval=-stdv, maxval=stdv)
    bias = jnp.zeros((rows, cols), dtype)
    return W, U, bias


def _reference(W, U, bias, x, h, activation):
    pre = W @ x + U @ h + bias
    return jax.nn.sigmoid(pre) if activation == "sigmoid" else jnp.tanh(pre)


def _bf16_round(a):
    return a.astype(jnp.bfloat16).astype(jnp.float32)


# ---------------------------------------------------------------------------
# Self-test
# ---------------------------------------------------------------------------
if __name__ == "__main__":
    key = jax.random.PRNGKey(0)

    # --- Exact f32-compute path: small EvolveGCN-gate shapes --------------
    for rows, cols, act in [(32, 16, "sigmoid"), (32, 16, "tanh")]:
        key, kp, kx, kh = jax.random.split(key, 4)
        W, U, bias = init_params(kp, rows, cols)
        x = jax.random.normal(kx, (rows, cols), jnp.float32)
        hidden = jax.random.normal(kh, (rows, cols), jnp.float32)

        out = jax.block_until_ready(
            mat_gru_gate(W, U, bias, x, hidden, activation=act,
                         compute_dtype=jnp.float32))
        ref = _reference(W, U, bias, x, hidden, act)
        assert out.shape == (rows, cols)
        assert jnp.allclose(out, ref, atol=1e-5, rtol=1e-5), (rows, cols, act)

    # --- Default bf16-compute path: ragged multi-tile column axis ---------
    rows, cols, act = 32, 600, "sigmoid"
    key, kp, kx, kh = jax.random.split(key, 4)
    W, U, bias = init_params(kp, rows, cols)
    x = jax.random.normal(kx, (rows, cols), jnp.float32)
    hidden = jax.random.normal(kh, (rows, cols), jnp.float32)

    out = jax.block_until_ready(
        mat_gru_gate(W, U, bias, x, hidden, activation=act))
    ref_bf16 = _reference(_bf16_round(W), _bf16_round(U), _bf16_round(bias),
                          _bf16_round(x), _bf16_round(hidden), act)
    ref_f32 = _reference(W, U, bias, x, hidden, act)
    assert out.shape == (rows, cols)
    assert jnp.allclose(out, ref_bf16, atol=1e-4, rtol=1e-4)
    assert jnp.allclose(out, ref_f32, atol=2e-2, rtol=2e-2)

    # --- Fused update + reset gates (shared x/hidden, one pallas_call) ----
    key, kp2, kx, kh = jax.random.split(key, 4)
    Wu, Uu, bu = init_params(kp, rows, cols)
    Wr, Ur, br = init_params(kp2, rows, cols)
    x = jax.random.normal(kx, (rows, cols), jnp.float32)
    hidden = jax.random.normal(kh, (rows, cols), jnp.float32)

    upd, rst = mat_gru_gates_fused([Wu, Wr], [Uu, Ur], [bu, br], x, hidden,
                                   activation="sigmoid",
                                   compute_dtype=jnp.float32)
    jax.block_until_ready(rst)
    assert jnp.allclose(upd, _reference(Wu, Uu, bu, x, hidden, "sigmoid"),
                        atol=1e-5, rtol=1e-5)
    assert jnp.allclose(rst, _reference(Wr, Ur, br, x, hidden, "sigmoid"),
                        atol=1e-5, rtol=1e-5)

    print("KERNEL_OK")
</pallas_src>

<mosaic_0001>
module attributes {stable_mosaic.version = 11 : i64} {
  func.func @_gru_gate_kernel(%arg0: i32, %arg1: memref<32x32xf32, #tpu.memory_space<vmem>>, %arg2: memref<32x32xf32, #tpu.memory_space<vmem>>, %arg3: memref<32x16xf32, #tpu.memory_space<vmem>>, %arg4: memref<32x16xf32, #tpu.memory_space<vmem>>, %arg5: memref<32x16xf32, #tpu.memory_space<vmem>>, %arg6: memref<32x16xf32, #tpu.memory_space<vmem>>) attributes {dimension_semantics = [#tpu.dimension_semantics<parallel>], iteration_bounds = array<i64: 1>, scalar_prefetch = 0 : i64, scratch_operands = 0 : i64, tpu.core_type = #tpu.core_type<tc>, window_params = [{pipeline_mode = #tpu.pipeline_mode<synchronous>, transform_indices = @transform_0, window_bounds = array<i64: 32, 32>}, {pipeline_mode = #tpu.pipeline_mode<synchronous>, transform_indices = @transform_1, window_bounds = array<i64: 32, 32>}, {transform_indices = @transform_2, window_bounds = array<i64: 32, 16>}, {transform_indices = @transform_3, window_bounds = array<i64: 32, 16>}, {transform_indices = @transform_4, window_bounds = array<i64: 32, 16>}, {transform_indices = @transform_5, window_bounds = array<i64: 32, 16>}]} {
    %c0 = arith.constant 0 : index
    %c0_0 = arith.constant 0 : index
    %0 = vector.load %arg1[%c0, %c0_0] : memref<32x32xf32, #tpu.memory_space<vmem>>, vector<32x32xf32>
    %c0_1 = arith.constant 0 : index
    %c0_2 = arith.constant 0 : index
    %1 = vector.load %arg4[%c0_1, %c0_2] : memref<32x16xf32, #tpu.memory_space<vmem>>, vector<32x16xf32>
    %cst = arith.constant dense<0.000000e+00> : vector<32x16xf32>
    %2 = tpu.matmul %0, %1, %cst {dimension_numbers = #tpu.dot_dimension_numbers<[1], [0], [0], [1], [0, 0, 1, 1], [], []>} : vector<32x32xf32>, vector<32x16xf32>, vector<32x16xf32> -> vector<32x16xf32>
    %c0_3 = arith.constant 0 : index
    %c0_4 = arith.constant 0 : index
    %3 = vector.load %arg2[%c0_3, %c0_4] : memref<32x32xf32, #tpu.memory_space<vmem>>, vector<32x32xf32>
    %c0_5 = arith.constant 0 : index
    %c0_6 = arith.constant 0 : index
    %4 = vector.load %arg5[%c0_5, %c0_6] : memref<32x16xf32, #tpu.memory_space<vmem>>, vector<32x16xf32>
    %cst_7 = arith.constant dense<0.000000e+00> : vector<32x16xf32>
    %5 = tpu.matmul %3, %4, %cst_7 {dimension_numbers = #tpu.dot_dimension_numbers<[1], [0], [0], [1], [0, 0, 1, 1], [], []>} : vector<32x32xf32>, vector<32x16xf32>, vector<32x16xf32> -> vector<32x16xf32>
    %6 = arith.addf %2, %5 : vector<32x16xf32>
    %c0_8 = arith.constant 0 : index
    %c0_9 = arith.constant 0 : index
    %7 = vector.load %arg3[%c0_8, %c0_9] : memref<32x16xf32, #tpu.memory_space<vmem>>, vector<32x16xf32>
    %8 = arith.addf %6, %7 : vector<32x16xf32>
    %9 = arith.negf %8 : vector<32x16xf32>
    %10 = math.exp %9 : vector<32x16xf32>
    %cst_10 = arith.constant 1.000000e+00 : f32
    %11 = vector.broadcast %cst_10 : f32 to vector<32x16xf32>
    %12 = arith.addf %11, %10 : vector<32x16xf32>
    %13 = arith.divf %11, %12 : vector<32x16xf32>
    %c0_11 = arith.constant 0 : index
    %c0_12 = arith.constant 0 : index
    %14 = vector.load %arg6[%c0_11, %c0_12] : memref<32x16xf32, #tpu.memory_space<vmem>>, vector<32x16xf32>
    tpu.vector_store %arg6[%c0_11, %c0_12], %13 {strides = array<i32>} : memref<32x16xf32, #tpu.memory_space<vmem>>, vector<32x16xf32>,
    return
  }
  func.func @transform_0(%arg0: i32) -> (i32, i32) {
    %c0_i32 = arith.constant 0 : i32
    %c0_i32_0 = arith.constant 0 : i32
    %c0_i32_1 = arith.constant 0 : i32
    return %c0_i32, %c0_i32_0 : i32, i32
  }
  func.func @transform_1(%arg0: i32) -> (i32, i32) {
    %c0_i32 = arith.constant 0 : i32
    %c0_i32_0 = arith.constant 0 : i32
    %c0_i32_1 = arith.constant 0 : i32
    return %c0_i32, %c0_i32_0 : i32, i32
  }
  func.func @transform_2(%arg0: i32) -> (i32, i32) {
    %c0_i32 = arith.constant 0 : i32
    %c0_i32_0 = arith.constant 0 : i32
    return %c0_i32, %arg0 : i32, i32
  }
  func.func @transform_3(%arg0: i32) -> (i32, i32) {
    %c0_i32 = arith.constant 0 : i32
    %c0_i32_0 = arith.constant 0 : i32
    return %c0_i32, %arg0 : i32, i32
  }
  func.func @transform_4(%arg0: i32) -> (i32, i32) {
    %c0_i32 = arith.constant 0 : i32
    %c0_i32_0 = arith.constant 0 : i32
    return %c0_i32, %arg0 : i32, i32
  }
  func.func @transform_5(%arg0: i32) -> (i32, i32) {
    %c0_i32 = arith.constant 0 : i32
    %c0_i32_0 = arith.constant 0 : i32
    return %c0_i32, %arg0 : i32, i32
  }
}

</mosaic_0001>

<bundles_post_ra>
// kernel: tpu_custom_call.1
= control target key start
LH: loop header
LB: loop body
LE: loop exit
PB: predicated region body
PF: predicated region fallthrough
CT: control target
= control target key end

     0   :  { %vm36_vm0 = vcmask 261120   ;;  %vm263_vm1 = vcmask 130048   ;;  %s454_s4 = inlined_call_operand.vmem [shape: f32[32,16], index: 4, kind: input, shape index: {}]   ;;  %s455_s3 = inlined_call_operand.vmem [shape: f32[32,16], index: 3, kind: input, shape index: {}]   ;;  %s456_s1 = inlined_call_operand.vmem [shape: f32[32,32], index: 1, kind: input, shape index: {}]   ;;  %s457_s0 = inlined_call_operand.vmem [shape: f32[32,32], index: 0, kind: input, shape index: {}]   ;;  %s458_s2 = inlined_call_operand.vmem [shape: f32[32,16], index: 2, kind: input, shape index: {}]   ;;  %s459_s5 = inlined_call_operand.vmem [shape: f32[32,16], index: 5, kind: output, shape index: {}]  }
   0x1   :  { %v35_v0 = vld [vmem:[%s454_s4 + $0x18] sm:$0xff]  ;;  %v34_v2 = vld [vmem:[%s454_s4 + $0x10] sm:$0xff]  ;;  %v33_v4 = vld [vmem:[%s454_s4 + $0x8] sm:$0xff] }
   0x2   :  { %v27_v1 = vld [vmem:[%s455_s3 + $0x18] sm:$0xff]  ;;  %300 = vmatprep.subr.mxu0 %v35_v0  ;;  %v26_v3 = vld [vmem:[%s455_s3 + $0x10] sm:$0xff]  ;;  %v25_v5 = vld [vmem:[%s455_s3 + $0x8] sm:$0xff] }
   0x3   :  { %314 = vmatprep.subr.mxu1 %v27_v1  ;;  %301 = vmatpush3.msra.mxu0 %v35_v0  ;;  %v32_v6 = vld [vmem:[%s454_s4] sm:$0xff]  ;;  %v29_v10 = vld [vmem:[%s456_s1 + $0x8] sm:$0xff]  ;;  %v30_v12 = vld [vmem:[%s456_s1 + $0x10] sm:$0xff] }
   0x4   :  { %315 = vmatpush3.msra.mxu1 %v27_v1  ;;  %302 = vmatprep.subr.mxu0 %v34_v2  ;;  %v24_v7 = vld [vmem:[%s455_s3] sm:$0xff]  ;;  %v21_v11 = vld [vmem:[%s457_s0 + $0x8] sm:$0xff]  ;;  %v22_v13 = vld [vmem:[%s457_s0 + $0x10] sm:$0xff] }
   0x5   :  { %316 = vmatprep.subr.mxu1 %v26_v3  ;;  %303 = vmatpush3.msra.mxu0 %v34_v2  ;;  %v28_v8 = vld [vmem:[%s456_s1] sm:$0xff]  ;;  %v31_v14 = vld [vmem:[%s456_s1 + $0x18] sm:$0xff]  ;;  %v232_v18 = vld [vmem:[%s458_s2 + $0x8] sm:$0xff] }
   0x6   :  { %317 = vmatpush3.msra.mxu1 %v26_v3  ;;  %304 = vmatprep.subr.mxu0 %v33_v4  ;;  %v20_v9 = vld [vmem:[%s457_s0] sm:$0xff]  ;;  %v23_v15 = vld [vmem:[%s457_s0 + $0x18] sm:$0xff]  ;;  %v233_v33 = vld [vmem:[%s458_s2 + $0x10] sm:$0xff] }
   0x7   :  { %318 = vmatprep.subr.mxu1 %v25_v5  ;;  %305 = vmatpush3.msra.mxu0 %v33_v4  ;;  %v231_v22 = vld [vmem:[%s458_s2] sm:$0xff]  ;;  %v234_v27 = vld [vmem:[%s458_s2 + $0x18] sm:$0xff] }
   0x8   :  { %319 = vmatpush3.msra.mxu1 %v25_v5  ;;  %306 = vmatprep.subr.mxu0 %v32_v6 }
   0x9   :  { %320 = vmatprep.subr.mxu1 %v24_v7  ;;  %307 = vmatpush3.msra.mxu0 %v32_v6 }
   0xa   :  { %308 = vmatprep.mubr.msk.f32.mxu0 %vm36_vm0, %v28_v8  ;;  %321 = vmatpush3.msra.mxu1 %v24_v7 }
   0xb   :  { %322 = vmatprep.mubr.msk.f32.mxu1 %vm36_vm0, %v20_v9  ;;  %309 = vmatmul.mubr.msk.f32.vlgmr.msra.gmra.mxu0 %vm36_vm0, %v29_v10 }
   0xc   :  { %323 = vmatmul.mubr.msk.f32.vlgmr.msra.gmra.mxu1 %vm36_vm0, %v21_v11  ;;  %311 = vmatprep.mubr.msk.f32.mxu0 %vm36_vm0, %v30_v12 }
   0xd   :  { %325 = vmatprep.mubr.msk.f32.mxu1 %vm36_vm0, %v22_v13 }
   0xf   :  { %312 = vmatmul.mubr.msk.f32.gmra.mxu0 %vm36_vm0, %v31_v14 }
  0x10   :  { %326 = vmatmul.mubr.msk.f32.gmra.mxu1 %vm36_vm0, %v23_v15 }
  0xcb   :  { %v310_v16 = vpop.f32.mrf.mxu0 }
  0xcc   :  { %v324_v17 = vpop.f32.mrf.mxu1 }
  0xcd   :  { %v218_v19 = vadd.f32 %v324_v17, %v310_v16  ;;  %v115_v20 = vpop.f32.mrf.mxu0 }
  0xce   :  { %v212_v21 = vpop.f32.mrf.mxu1 }
  0xcf   :  { %v236_v23 = vadd.f32 %v232_v18, %v218_v19  ;;  %v213_v24 = vadd.f32 %v212_v21, %v115_v20  ;;  %v313_v25 = vpop.f32.mrf.mxu0 }
  0xd0   :  { %v327_v26 = vpop.f32.mrf.mxu1 }
  0xd1   :  { %v281_v28 = vmul.f32 -1.442695, %v236_v23  ;;  %v235_v29 = vadd.f32 %v231_v22, %v213_v24  ;;  %v228_v30 = vadd.f32 %v327_v26, %v313_v25  ;;  %v125_v31 = vpop.f32.mrf.mxu0 }
  0xd2   :  { %v222_v32 = vpop.f32.mrf.mxu1 }
  0xd3   :  { %328 = vpow2.f32 %v281_v28  ;;  %v280_v34 = vmul.f32 -1.442695, %v235_v29  ;;  %v238_v35 = vadd.f32 %v234_v27, %v228_v30  ;;  %v223_v36 = vadd.f32 %v222_v32, %v125_v31 }
  0xd5   :  { %330 = vpow2.f32 %v280_v34  ;;  %v283_v37 = vmul.f32 -1.442695, %v238_v35  ;;  %v237_v38 = vadd.f32 %v233_v33, %v223_v36 }
  0xd7   :  { %332 = vpow2.f32 %v283_v37  ;;  %v282_v39 = vmul.f32 -1.442695, %v237_v38 }
  0xd9   :  { %334 = vpow2.f32 %v282_v39 }
  0xe0   :  { %v329_v40 = vpop.eup %328 }
  0xe1   :  { %v252_v41 = vadd.f32 1.0, %v329_v40 }
  0xe2   :  { %v331_v42 = vpop.eup %330 }
  0xe3   :  { %336 = vrcp.f32 %v252_v41  ;;  %v251_v43 = vadd.f32 1.0, %v331_v42 }
  0xe4   :  { %v333_v44 = vpop.eup %332 }
  0xe5   :  { %338 = vrcp.f32 %v251_v43  ;;  %v254_v45 = vadd.f32 1.0, %v333_v44 }
  0xe6   :  { %v335_v46 = vpop.eup %334 }
  0xe7   :  { %340 = vrcp.f32 %v254_v45  ;;  %v253_v47 = vadd.f32 1.0, %v335_v46 }
  0xe9   :  { %342 = vrcp.f32 %v253_v47 }
  0xf0   :  { %v337_v48 = vpop.eup %336 }
  0xf1   :  { %265 = vst.msk [vmem:[%s459_s5 + $0x8] sm:$0xff] %vm263_vm1, %v337_v48 }
  0xf2   :  { %v339_v49 = vpop.eup %338 }
  0xf3   :  { %264 = vst.msk [vmem:[%s459_s5] sm:$0xff] %vm263_vm1, %v339_v49 }
  0xf4   :  { %v341_v50 = vpop.eup %340 }
  0xf5   :  { %267 = vst.msk [vmem:[%s459_s5 + $0x18] sm:$0xff] %vm263_vm1, %v341_v50 }
  0xf6   :  { %v343_v51 = vpop.eup %342 }
  0xf7   :  { %266 = vst.msk [vmem:[%s459_s5 + $0x10] sm:$0xff] %vm263_vm1, %v343_v51 }

</bundles_post_ra>
